<compile_context>
chip_gen: v6e
topology: v6e:2x2x1
jax: 0.10.0
libtpu: 0.0.40
codegen_flags: <defaults>
</compile_context>

<pallas_src>
import jax
import jax.numpy as jnp
from jax.experimental import pallas as pl
from jax.experimental.pallas import tpu as pltpu

# VPPrecond hyper-parameters (defaults of the PyTorch module)
BETA_D = 19.9
BETA_MIN = 0.1
M_STEPS = 1000
EPSILON_T = 1e-5
# use_fp16=False -> everything stays float32 (matches the PyTorch default path)


def _sigma(t):
    t = jnp.asarray(t, jnp.float32)
    return jnp.sqrt(jnp.exp(0.5 * BETA_D * t**2 + BETA_MIN * t) - 1.0)


def _sigma_inv(sigma):
    sigma = jnp.asarray(sigma, jnp.float32)
    return (jnp.sqrt(BETA_MIN**2 + 2.0 * BETA_D * jnp.log(1.0 + sigma**2))
            - BETA_MIN) / BETA_D


# Module-level schedule constants (mirrors VPPrecond.__init__).
SIGMA_MIN = float(_sigma(EPSILON_T))
SIGMA_MAX = float(_sigma(1.0))


def _handle_sigma(sigma, batch_size):
    """Mirror of handle_sigma: float/0-d/1-d sigma -> (batch,) f32."""
    sigma = jnp.asarray(sigma, jnp.float32).reshape(-1)
    if sigma.shape[0] == 1:
        sigma = jnp.broadcast_to(sigma, (batch_size,))
    # NOTE: trace-time check only (static shapes); fine for this script.
    assert sigma.shape[0] == batch_size, (
        "sigma must have batch_size equal to 1 or the batch size of x")
    return sigma


def _physical_vmem_bytes():
    """Per-core VMEM capacity (128 MiB v5e/v6e, 64 MiB v7x); safe fallback."""
    try:
        return int(pltpu.get_tpu_info().vmem_capacity_bytes)
    except Exception:
        return 64 * 1024 * 1024   # conservative (v7x per-TC)


def _choose_row_tile(total_rows, target_rows, batch, min_steps=4):
    """Pick the sublane (row) tile for the (N, C, ROWS, 128) layout.

    Largest divisor of `total_rows` that is a multiple of 8 and <= target_rows,
    preferring sizes that still leave >= min_steps total grid steps so a 2-TC
    chip (v7x) has work for both cores. Falls back to the full axis.
    """
    if total_rows % 8 != 0:
        return total_rows                      # full axis (always legal)
    target_rows = max(8, target_rows)
    divs = [r for r in range(8, total_rows + 1, 8) if total_rows % r == 0]
    fitting = [r for r in divs if r <= target_rows]
    if not fitting:
        return total_rows
    ok = [r for r in fitting if batch * (total_rows // r) >= min_steps]
    return (ok if ok else fitting)[-1]


def _make_vp_kernel_nchw(C):
    """Kernel for the (N, C, ROWS, 128) layout (ROWS >= 8).

    ws_ref   : SMEM flat (N*C*C,) f32 -- per-batch folded weights I + c_out*c_in*W
    beff_ref : SMEM flat (N*C,)   f32 -- per-batch effective bias c_out*(b + c_noise*nw)
    x_ref    : VMEM (1, C, row_tile, 128) f32
    o_ref    : VMEM (1, C, row_tile, 128) f32
    """

    def kernel(ws_ref, beff_ref, x_ref, o_ref):
        n = pl.program_id(0)
        # j-outer MAC: each input-channel slab is loaded once, feeds C accums.
        accs = [None] * C
        for j in range(C):
            xj = x_ref[0, j]                               # (row_tile, 128)
            for c in range(C):
                t = ws_ref[(n * C + c) * C + j] * xj
                accs[c] = t if accs[c] is None else accs[c] + t
        for c in range(C):
            o_ref[0, c] = accs[c] + beff_ref[n * C + c]    # dense per-channel store

    return kernel


def _make_vp_kernel_folded(C, ROWS):
    """Kernel for the small-image layout (N, C*ROWS, 128) (ROWS < 8).

    Channels live on the sublane axis so the whole block is (8,128)-dense even
    for tiny spatial sizes; the single store per block is unmasked.
    """

    def kernel(ws_ref, beff_ref, x_ref, o_ref):
        n = pl.program_id(0)
        x = x_ref[0]                                       # (C*ROWS, 128)
        accs = [None] * C
        for j in range(C):
            xj = x[j * ROWS:(j + 1) * ROWS]                # (ROWS, 128), static slice
            for c in range(C):
                t = ws_ref[(n * C + c) * C + j] * xj
                accs[c] = t if accs[c] is None else accs[c] + t
        outs = [accs[c] + beff_ref[n * C + c] for c in range(C)]
        o_ref[0] = jnp.concatenate(outs, axis=0)           # one dense block store

    return kernel


def vp_precond_forward(x_nchw, sigma, conv_w, conv_b, noise_w,
                       *, target_block_bytes=4 * 1024 * 1024):
    """JAX wrapper reproducing VPPrecond.forward with the synthetic inner model
    (1x1 conv `conv_w/conv_b` + per-channel noise embedding `noise_w`)."""
    x_nchw = x_nchw.astype(jnp.float32)
    N, C, H, W = x_nchw.shape
    HW = H * W
    # TODO(synk): add a padded/masked path for spatial sizes not divisible by 128.
    assert HW % 128 == 0, "H*W must be a multiple of 128 (lane width)"
    ROWS = HW // 128

    # Per-batch preconditioning scalars (plain-JAX glue, O(batch)).
    sig = _handle_sigma(sigma, N)                                   # (N,)
    c_out = -sig                                                    # (N,)
    c_in = 1.0 / jnp.sqrt(sig**2 + 1.0)                             # (N,)
    c_noise = (M_STEPS - 1) * _sigma_inv(sig)                       # (N,)

    # Fold residual identity + preconditioning scalars into the model params:
    #   D(x) = (I + c_out*c_in*W) @ x + c_out*(b + c_noise*nw)
    conv_w = conv_w.astype(jnp.float32)
    conv_b = conv_b.astype(jnp.float32).reshape(C)
    noise_w = noise_w.astype(jnp.float32).reshape(C)
    eye = jnp.eye(C, dtype=jnp.float32)
    ws = eye[None] + (c_out * c_in)[:, None, None] * conv_w[None]   # (N, C, C)
    beff = c_out[:, None] * (conv_b[None, :]
                             + c_noise[:, None] * noise_w[None, :])  # (N, C)
    # Flat 1-D SMEM scalar tables (pad to next_pow2(4*N*C*C) bytes — tiny).
    ws_flat = ws.reshape(-1)
    beff_flat = beff.reshape(-1)

    phys_vmem = _physical_vmem_bytes()

    if ROWS < 8:
        # ---- small-image path: fold channels into the sublane axis ----------
        x = x_nchw.reshape(N, C * ROWS, 128)
        block_bytes = C * ROWS * 128 * 4
        vmem_limit = int(min(3 * phys_vmem // 4,
                             max(10 * block_bytes, 8 * 1024 * 1024)))
        out = pl.pallas_call(
            _make_vp_kernel_folded(C, ROWS),
            out_shape=jax.ShapeDtypeStruct((N, C * ROWS, 128), jnp.float32),
            grid=(N,),
            in_specs=[
                pl.BlockSpec(memory_space=pltpu.MemorySpace.SMEM),     # ws_flat
                pl.BlockSpec(memory_space=pltpu.MemorySpace.SMEM),     # beff_flat
                pl.BlockSpec((1, C * ROWS, 128), lambda n: (n, 0, 0)),  # x
            ],
            out_specs=pl.BlockSpec((1, C * ROWS, 128), lambda n: (n, 0, 0)),
            compiler_params=pltpu.CompilerParams(
                dimension_semantics=("parallel",),
                vmem_limit_bytes=vmem_limit),
        )(ws_flat, beff_flat, x)
        return out.reshape(N, C, H, W)

    # ---- general path: (N, C, ROWS, 128), row-tiled spatial axis -------------
    x = x_nchw.reshape(N, C, ROWS, 128)
    # Block sizing: big blocks (default 4 MiB) amortize the ~0.35 us per-step
    # overhead; this matters MOST on v7x (fastest HBM => shortest steps). The
    # only real v7x constraint is total buffer bytes vs its 64 MiB VMEM, which
    # the phys_vmem-derived caps below handle (never shrink the tile for v7x).
    tgt_bytes = min(int(target_block_bytes), phys_vmem // 8)
    target_rows = max(8, tgt_bytes // (C * 128 * 4))
    row_tile = _choose_row_tile(ROWS, target_rows, N)
    n_row_tiles = ROWS // row_tile
    block_bytes = C * row_tile * 128 * 4
    # Generation-aware scoped-VMEM limit: cover 2x(in+out) double buffers plus
    # elementwise temporaries, capped at 3/4 of physical VMEM (96 MiB on
    # v5e/v6e, 48 MiB on v7x).
    vmem_limit = int(min(3 * phys_vmem // 4,
                         max(10 * block_bytes, 32 * 1024 * 1024)))

    out = pl.pallas_call(
        _make_vp_kernel_nchw(C),
        out_shape=jax.ShapeDtypeStruct((N, C, ROWS, 128), jnp.float32),
        grid=(N, n_row_tiles),
        in_specs=[
            pl.BlockSpec(memory_space=pltpu.MemorySpace.SMEM),          # ws_flat
            pl.BlockSpec(memory_space=pltpu.MemorySpace.SMEM),          # beff_flat
            pl.BlockSpec((1, C, row_tile, 128),
                         lambda n, r: (n, 0, r, 0)),                    # x
        ],
        out_specs=pl.BlockSpec((1, C, row_tile, 128),
                               lambda n, r: (n, 0, r, 0)),
        compiler_params=pltpu.CompilerParams(
            dimension_semantics=("parallel", "parallel"),
            vmem_limit_bytes=vmem_limit),
    )(ws_flat, beff_flat, x)
    return out.reshape(N, C, H, W)


def _reference_forward(x_nchw, sigma, conv_w, conv_b, noise_w):
    """Pure-JAX reference of the same forward (unfolded), for correctness."""
    x = x_nchw.astype(jnp.float32)
    N, C, H, W = x.shape
    sig = _handle_sigma(sigma, N).reshape(N, 1, 1, 1)
    c_out = -sig
    c_in = 1.0 / jnp.sqrt(sig**2 + 1.0)
    c_noise = (M_STEPS - 1) * _sigma_inv(sig).reshape(N, 1, 1, 1)
    y = c_in * x
    f = jnp.einsum("oc,nchw->nohw", conv_w, y)
    f = f + conv_b.reshape(1, C, 1, 1) + c_noise * noise_w.reshape(1, C, 1, 1)
    return x + c_out * f


if __name__ == "__main__":
    key = jax.random.PRNGKey(0)
    k_x, k_w, k_b, k_n, k_s, k_x2 = jax.random.split(key, 6)

    N, C, H, W = 2, 4, 16, 16
    x = jax.random.normal(k_x, (N, C, H, W), jnp.float32)
    sigma = jax.random.uniform(k_s, (N,), jnp.float32, 0.1, 3.0)

    # Deterministic synthetic inner-model parameters (1x1 conv + noise emb).
    conv_w = jax.random.normal(k_w, (C, C), jnp.float32) * 0.3
    conv_b = jax.random.normal(k_b, (C,), jnp.float32) * 0.1
    noise_w = jax.random.normal(k_n, (C,), jnp.float32) * 0.01

    # 1) Main test at the reference shape (small path: ROWS = 2 < 8).
    d_x = jax.block_until_ready(
        vp_precond_forward(x, sigma, conv_w, conv_b, noise_w))
    ref = jax.block_until_ready(
        _reference_forward(x, sigma, conv_w, conv_b, noise_w))
    assert d_x.shape == (N, C, H, W) and d_x.dtype == jnp.float32
    assert jnp.allclose(d_x, ref, atol=1e-4, rtol=1e-4), "mismatch vs reference"

    # 2) Float-sigma path of handle_sigma.
    d_x2 = jax.block_until_ready(
        vp_precond_forward(x, 0.7, conv_w, conv_b, noise_w))
    ref2 = _reference_forward(x, 0.7, conv_w, conv_b, noise_w)
    assert jnp.allclose(d_x2, ref2, atol=1e-4, rtol=1e-4)

    # 3) Larger image exercises the row-tiled pipelined path (default blocks).
    H2 = W2 = 64
    x_big = jax.random.normal(k_x2, (N, C, H2, W2), jnp.float32)
    d_x3 = jax.block_until_ready(
        vp_precond_forward(x_big, sigma, conv_w, conv_b, noise_w))
    ref3 = _reference_forward(x_big, sigma, conv_w, conv_b, noise_w)
    assert jnp.allclose(d_x3, ref3, atol=1e-4, rtol=1e-4)

    # 4) Same image with a tiny block budget forces several row tiles / steps.
    d_x4 = jax.block_until_ready(
        vp_precond_forward(x_big, sigma, conv_w, conv_b, noise_w,
                           target_block_bytes=16 * 1024))
    assert jnp.allclose(d_x4, ref3, atol=1e-4, rtol=1e-4)

    print("KERNEL_OK")
</pallas_src>

<mosaic_0001>
module attributes {stable_mosaic.version = 11 : i64} {
  func.func @kernel(%arg0: i32, %arg1: memref<32xf32, #tpu.memory_space<smem>>, %arg2: memref<8xf32, #tpu.memory_space<smem>>, %arg3: memref<1x8x128xf32, #tpu.memory_space<vmem>>, %arg4: memref<1x8x128xf32, #tpu.memory_space<vmem>>) attributes {dimension_semantics = [#tpu.dimension_semantics<parallel>], iteration_bounds = array<i64: 2>, scalar_prefetch = 0 : i64, scratch_operands = 0 : i64, tpu.core_type = #tpu.core_type<tc>, window_params = [{transform_indices = @transform_0, window_bounds = array<i64: 32>}, {transform_indices = @transform_1, window_bounds = array<i64: 8>}, {transform_indices = @transform_2, window_bounds = array<i64: 1, 8, 128>}, {transform_indices = @transform_3, window_bounds = array<i64: 1, 8, 128>}]} {
    %c0 = arith.constant 0 : index
    %c0_0 = arith.constant 0 : index
    %c0_1 = arith.constant 0 : index
    %0 = vector.load %arg3[%c0, %c0_0, %c0_1] : memref<1x8x128xf32, #tpu.memory_space<vmem>>, vector<1x8x128xf32>
    %1 = vector.shape_cast %0 : vector<1x8x128xf32> to vector<8x128xf32>
    %2 = vector.extract_strided_slice %1 {offsets = [0, 0], sizes = [2, 128], strides = [1, 1]} : vector<8x128xf32> to vector<2x128xf32>
    %c4_i32 = arith.constant 4 : i32
    %3 = arith.muli %arg0, %c4_i32 : i32
    %c0_i32 = arith.constant 0 : i32
    %4 = arith.addi %3, %c0_i32 : i32
    %c4_i32_2 = arith.constant 4 : i32
    %5 = arith.muli %4, %c4_i32_2 : i32
    %c0_i32_3 = arith.constant 0 : i32
    %6 = arith.addi %5, %c0_i32_3 : i32
    %7 = arith.index_cast %6 : i32 to index
    %8 = memref.load %arg1[%7] : memref<32xf32, #tpu.memory_space<smem>>
    %9 = vector.broadcast %8 : f32 to vector<2x128xf32>
    %10 = arith.mulf %9, %2 : vector<2x128xf32>
    %c4_i32_4 = arith.constant 4 : i32
    %11 = arith.muli %arg0, %c4_i32_4 : i32
    %c1_i32 = arith.constant 1 : i32
    %12 = arith.addi %11, %c1_i32 : i32
    %c4_i32_5 = arith.constant 4 : i32
    %13 = arith.muli %12, %c4_i32_5 : i32
    %c0_i32_6 = arith.constant 0 : i32
    %14 = arith.addi %13, %c0_i32_6 : i32
    %15 = arith.index_cast %14 : i32 to index
    %16 = memref.load %arg1[%15] : memref<32xf32, #tpu.memory_space<smem>>
    %17 = vector.broadcast %16 : f32 to vector<2x128xf32>
    %18 = arith.mulf %17, %2 : vector<2x128xf32>
    %c4_i32_7 = arith.constant 4 : i32
    %19 = arith.muli %arg0, %c4_i32_7 : i32
    %c2_i32 = arith.constant 2 : i32
    %20 = arith.addi %19, %c2_i32 : i32
    %c4_i32_8 = arith.constant 4 : i32
    %21 = arith.muli %20, %c4_i32_8 : i32
    %c0_i32_9 = arith.constant 0 : i32
    %22 = arith.addi %21, %c0_i32_9 : i32
    %23 = arith.index_cast %22 : i32 to index
    %24 = memref.load %arg1[%23] : memref<32xf32, #tpu.memory_space<smem>>
    %25 = vector.broadcast %24 : f32 to vector<2x128xf32>
    %26 = arith.mulf %25, %2 : vector<2x128xf32>
    %c4_i32_10 = arith.constant 4 : i32
    %27 = arith.muli %arg0, %c4_i32_10 : i32
    %c3_i32 = arith.constant 3 : i32
    %28 = arith.addi %27, %c3_i32 : i32
    %c4_i32_11 = arith.constant 4 : i32
    %29 = arith.muli %28, %c4_i32_11 : i32
    %c0_i32_12 = arith.constant 0 : i32
    %30 = arith.addi %29, %c0_i32_12 : i32
    %31 = arith.index_cast %30 : i32 to index
    %32 = memref.load %arg1[%31] : memref<32xf32, #tpu.memory_space<smem>>
    %33 = vector.broadcast %32 : f32 to vector<2x128xf32>
    %34 = arith.mulf %33, %2 : vector<2x128xf32>
    %35 = vector.extract_strided_slice %1 {offsets = [2, 0], sizes = [2, 128], strides = [1, 1]} : vector<8x128xf32> to vector<2x128xf32>
    %c4_i32_13 = arith.constant 4 : i32
    %36 = arith.muli %arg0, %c4_i32_13 : i32
    %c0_i32_14 = arith.constant 0 : i32
    %37 = arith.addi %36, %c0_i32_14 : i32
    %c4_i32_15 = arith.constant 4 : i32
    %38 = arith.muli %37, %c4_i32_15 : i32
    %c1_i32_16 = arith.constant 1 : i32
    %39 = arith.addi %38, %c1_i32_16 : i32
    %40 = arith.index_cast %39 : i32 to index
    %41 = memref.load %arg1[%40] : memref<32xf32, #tpu.memory_space<smem>>
    %42 = vector.broadcast %41 : f32 to vector<2x128xf32>
    %43 = arith.mulf %42, %35 : vector<2x128xf32>
    %44 = arith.addf %10, %43 : vector<2x128xf32>
    %c4_i32_17 = arith.constant 4 : i32
    %45 = arith.muli %arg0, %c4_i32_17 : i32
    %c1_i32_18 = arith.constant 1 : i32
    %46 = arith.addi %45, %c1_i32_18 : i32
    %c4_i32_19 = arith.constant 4 : i32
    %47 = arith.muli %46, %c4_i32_19 : i32
    %c1_i32_20 = arith.constant 1 : i32
    %48 = arith.addi %47, %c1_i32_20 : i32
    %49 = arith.index_cast %48 : i32 to index
    %50 = memref.load %arg1[%49] : memref<32xf32, #tpu.memory_space<smem>>
    %51 = vector.broadcast %50 : f32 to vector<2x128xf32>
    %52 = arith.mulf %51, %35 : vector<2x128xf32>
    %53 = arith.addf %18, %52 : vector<2x128xf32>
    %c4_i32_21 = arith.constant 4 : i32
    %54 = arith.muli %arg0, %c4_i32_21 : i32
    %c2_i32_22 = arith.constant 2 : i32
    %55 = arith.addi %54, %c2_i32_22 : i32
    %c4_i32_23 = arith.constant 4 : i32
    %56 = arith.muli %55, %c4_i32_23 : i32
    %c1_i32_24 = arith.constant 1 : i32
    %57 = arith.addi %56, %c1_i32_24 : i32
    %58 = arith.index_cast %57 : i32 to index
    %59 = memref.load %arg1[%58] : memref<32xf32, #tpu.memory_space<smem>>
    %60 = vector.broadcast %59 : f32 to vector<2x128xf32>
    %61 = arith.mulf %60, %35 : vector<2x128xf32>
    %62 = arith.addf %26, %61 : vector<2x128xf32>
    %c4_i32_25 = arith.constant 4 : i32
    %63 = arith.muli %arg0, %c4_i32_25 : i32
    %c3_i32_26 = arith.constant 3 : i32
    %64 = arith.addi %63, %c3_i32_26 : i32
    %c4_i32_27 = arith.constant 4 : i32
    %65 = arith.muli %64, %c4_i32_27 : i32
    %c1_i32_28 = arith.constant 1 : i32
    %66 = arith.addi %65, %c1_i32_28 : i32
    %67 = arith.index_cast %66 : i32 to index
    %68 = memref.load %arg1[%67] : memref<32xf32, #tpu.memory_space<smem>>
    %69 = vector.broadcast %68 : f32 to vector<2x128xf32>
    %70 = arith.mulf %69, %35 : vector<2x128xf32>
    %71 = arith.addf %34, %70 : vector<2x128xf32>
    %72 = vector.extract_strided_slice %1 {offsets = [4, 0], sizes = [2, 128], strides = [1, 1]} : vector<8x128xf32> to vector<2x128xf32>
    %c4_i32_29 = arith.constant 4 : i32
    %73 = arith.muli %arg0, %c4_i32_29 : i32
    %c0_i32_30 = arith.constant 0 : i32
    %74 = arith.addi %73, %c0_i32_30 : i32
    %c4_i32_31 = arith.constant 4 : i32
    %75 = arith.muli %74, %c4_i32_31 : i32
    %c2_i32_32 = arith.constant 2 : i32
    %76 = arith.addi %75, %c2_i32_32 : i32
    %77 = arith.index_cast %76 : i32 to index
    %78 = memref.load %arg1[%77] : memref<32xf32, #tpu.memory_space<smem>>
    %79 = vector.broadcast %78 : f32 to vector<2x128xf32>
    %80 = arith.mulf %79, %72 : vector<2x128xf32>
    %81 = arith.addf %44, %80 : vector<2x128xf32>
    %c4_i32_33 = arith.constant 4 : i32
    %82 = arith.muli %arg0, %c4_i32_33 : i32
    %c1_i32_34 = arith.constant 1 : i32
    %83 = arith.addi %82, %c1_i32_34 : i32
    %c4_i32_35 = arith.constant 4 : i32
    %84 = arith.muli %83, %c4_i32_35 : i32
    %c2_i32_36 = arith.constant 2 : i32
    %85 = arith.addi %84, %c2_i32_36 : i32
    %86 = arith.index_cast %85 : i32 to index
    %87 = memref.load %arg1[%86] : memref<32xf32, #tpu.memory_space<smem>>
    %88 = vector.broadcast %87 : f32 to vector<2x128xf32>
    %89 = arith.mulf %88, %72 : vector<2x128xf32>
    %90 = arith.addf %53, %89 : vector<2x128xf32>
    %c4_i32_37 = arith.constant 4 : i32
    %91 = arith.muli %arg0, %c4_i32_37 : i32
    %c2_i32_38 = arith.constant 2 : i32
    %92 = arith.addi %91, %c2_i32_38 : i32
    %c4_i32_39 = arith.constant 4 : i32
    %93 = arith.muli %92, %c4_i32_39 : i32
    %c2_i32_40 = arith.constant 2 : i32
    %94 = arith.addi %93, %c2_i32_40 : i32
    %95 = arith.index_cast %94 : i32 to index
    %96 = memref.load %arg1[%95] : memref<32xf32, #tpu.memory_space<smem>>
    %97 = vector.broadcast %96 : f32 to vector<2x128xf32>
    %98 = arith.mulf %97, %72 : vector<2x128xf32>
    %99 = arith.addf %62, %98 : vector<2x128xf32>
    %c4_i32_41 = arith.constant 4 : i32
    %100 = arith.muli %arg0, %c4_i32_41 : i32
    %c3_i32_42 = arith.constant 3 : i32
    %101 = arith.addi %100, %c3_i32_42 : i32
    %c4_i32_43 = arith.constant 4 : i32
    %102 = arith.muli %101, %c4_i32_43 : i32
    %c2_i32_44 = arith.constant 2 : i32
    %103 = arith.addi %102, %c2_i32_44 : i32
    %104 = arith.index_cast %103 : i32 to index
    %105 = memref.load %arg1[%104] : memref<32xf32, #tpu.memory_space<smem>>
    %106 = vector.broadcast %105 : f32 to vector<2x128xf32>
    %107 = arith.mulf %106, %72 : vector<2x128xf32>
    %108 = arith.addf %71, %107 : vector<2x128xf32>
    %109 = vector.extract_strided_slice %1 {offsets = [6, 0], sizes = [2, 128], strides = [1, 1]} : vector<8x128xf32> to vector<2x128xf32>
    %c4_i32_45 = arith.constant 4 : i32
    %110 = arith.muli %arg0, %c4_i32_45 : i32
    %c0_i32_46 = arith.constant 0 : i32
    %111 = arith.addi %110, %c0_i32_46 : i32
    %c4_i32_47 = arith.constant 4 : i32
    %112 = arith.muli %111, %c4_i32_47 : i32
    %c3_i32_48 = arith.constant 3 : i32
    %113 = arith.addi %112, %c3_i32_48 : i32
    %114 = arith.index_cast %113 : i32 to index
    %115 = memref.load %arg1[%114] : memref<32xf32, #tpu.memory_space<smem>>
    %116 = vector.broadcast %115 : f32 to vector<2x128xf32>
    %117 = arith.mulf %116, %109 : vector<2x128xf32>
    %118 = arith.addf %81, %117 : vector<2x128xf32>
    %c4_i32_49 = arith.constant 4 : i32
    %119 = arith.muli %arg0, %c4_i32_49 : i32
    %c1_i32_50 = arith.constant 1 : i32
    %120 = arith.addi %119, %c1_i32_50 : i32
    %c4_i32_51 = arith.constant 4 : i32
    %121 = arith.muli %120, %c4_i32_51 : i32
    %c3_i32_52 = arith.constant 3 : i32
    %122 = arith.addi %121, %c3_i32_52 : i32
    %123 = arith.index_cast %122 : i32 to index
    %124 = memref.load %arg1[%123] : memref<32xf32, #tpu.memory_space<smem>>
    %125 = vector.broadcast %124 : f32 to vector<2x128xf32>
    %126 = arith.mulf %125, %109 : vector<2x128xf32>
    %127 = arith.addf %90, %126 : vector<2x128xf32>
    %c4_i32_53 = arith.constant 4 : i32
    %128 = arith.muli %arg0, %c4_i32_53 : i32
    %c2_i32_54 = arith.constant 2 : i32
    %129 = arith.addi %128, %c2_i32_54 : i32
    %c4_i32_55 = arith.constant 4 : i32
    %130 = arith.muli %129, %c4_i32_55 : i32
    %c3_i32_56 = arith.constant 3 : i32
    %131 = arith.addi %130, %c3_i32_56 : i32
    %132 = arith.index_cast %131 : i32 to index
    %133 = memref.load %arg1[%132] : memref<32xf32, #tpu.memory_space<smem>>
    %134 = vector.broadcast %133 : f32 to vector<2x128xf32>
    %135 = arith.mulf %134, %109 : vector<2x128xf32>
    %136 = arith.addf %99, %135 : vector<2x128xf32>
    %c4_i32_57 = arith.constant 4 : i32
    %137 = arith.muli %arg0, %c4_i32_57 : i32
    %c3_i32_58 = arith.constant 3 : i32
    %138 = arith.addi %137, %c3_i32_58 : i32
    %c4_i32_59 = arith.constant 4 : i32
    %139 = arith.muli %138, %c4_i32_59 : i32
    %c3_i32_60 = arith.constant 3 : i32
    %140 = arith.addi %139, %c3_i32_60 : i32
    %141 = arith.index_cast %140 : i32 to index
    %142 = memref.load %arg1[%141] : memref<32xf32, #tpu.memory_space<smem>>
    %143 = vector.broadcast %142 : f32 to vector<2x128xf32>
    %144 = arith.mulf %143, %109 : vector<2x128xf32>
    %145 = arith.addf %108, %144 : vector<2x128xf32>
    %c4_i32_61 = arith.constant 4 : i32
    %146 = arith.muli %arg0, %c4_i32_61 : i32
    %c0_i32_62 = arith.constant 0 : i32
    %147 = arith.addi %146, %c0_i32_62 : i32
    %148 = arith.index_cast %147 : i32 to index
    %149 = memref.load %arg2[%148] : memref<8xf32, #tpu.memory_space<smem>>
    %150 = vector.broadcast %149 : f32 to vector<2x128xf32>
    %151 = arith.addf %118, %150 : vector<2x128xf32>
    %c4_i32_63 = arith.constant 4 : i32
    %152 = arith.muli %arg0, %c4_i32_63 : i32
    %c1_i32_64 = arith.constant 1 : i32
    %153 = arith.addi %152, %c1_i32_64 : i32
    %154 = arith.index_cast %153 : i32 to index
    %155 = memref.load %arg2[%154] : memref<8xf32, #tpu.memory_space<smem>>
    %156 = vector.broadcast %155 : f32 to vector<2x128xf32>
    %157 = arith.addf %127, %156 : vector<2x128xf32>
    %c4_i32_65 = arith.constant 4 : i32
    %158 = arith.muli %arg0, %c4_i32_65 : i32
    %c2_i32_66 = arith.constant 2 : i32
    %159 = arith.addi %158, %c2_i32_66 : i32
    %160 = arith.index_cast %159 : i32 to index
    %161 = memref.load %arg2[%160] : memref<8xf32, #tpu.memory_space<smem>>
    %162 = vector.broadcast %161 : f32 to vector<2x128xf32>
    %163 = arith.addf %136, %162 : vector<2x128xf32>
    %c4_i32_67 = arith.constant 4 : i32
    %164 = arith.muli %arg0, %c4_i32_67 : i32
    %c3_i32_68 = arith.constant 3 : i32
    %165 = arith.addi %164, %c3_i32_68 : i32
    %166 = arith.index_cast %165 : i32 to index
    %167 = memref.load %arg2[%166] : memref<8xf32, #tpu.memory_space<smem>>
    %168 = vector.broadcast %167 : f32 to vector<2x128xf32>
    %169 = arith.addf %145, %168 : vector<2x128xf32>
    %170 = tpu.concatenate %151, %157, %163, %169 in 0 : vector<2x128xf32>, vector<2x128xf32>, vector<2x128xf32>, vector<2x128xf32> -> vector<8x128xf32>
    %c0_69 = arith.constant 0 : index
    %c0_70 = arith.constant 0 : index
    %c0_71 = arith.constant 0 : index
    %171 = vector.load %arg4[%c0_69, %c0_70, %c0_71] : memref<1x8x128xf32, #tpu.memory_space<vmem>>, vector<1x8x128xf32>
    %172 = vector.shape_cast %171 : vector<1x8x128xf32> to vector<8x128xf32>
    %173 = vector.shape_cast %170 : vector<8x128xf32> to vector<1x8x128xf32>
    tpu.vector_store %arg4[%c0_69, %c0_70, %c0_71], %173 {strides = array<i32>} : memref<1x8x128xf32, #tpu.memory_space<vmem>>, vector<1x8x128xf32>,
    return
  }
  func.func @transform_0(%arg0: i32) -> i32 {
    %c0_i32 = arith.constant 0 : i32
    %c0_i32_0 = arith.constant 0 : i32
    return %c0_i32 : i32
  }
  func.func @transform_1(%arg0: i32) -> i32 {
    %c0_i32 = arith.constant 0 : i32
    %c0_i32_0 = arith.constant 0 : i32
    return %c0_i32 : i32
  }
  func.func @transform_2(%arg0: i32) -> (i32, i32, i32) {
    %c0_i32 = arith.constant 0 : i32
    %c0_i32_0 = arith.constant 0 : i32
    %c0_i32_1 = arith.constant 0 : i32
    return %arg0, %c0_i32, %c0_i32_0 : i32, i32, i32
  }
  func.func @transform_3(%arg0: i32) -> (i32, i32, i32) {
    %c0_i32 = arith.constant 0 : i32
    %c0_i32_0 = arith.constant 0 : i32
    %c0_i32_1 = arith.constant 0 : i32
    return %arg0, %c0_i32, %c0_i32_0 : i32, i32, i32
  }
}

</mosaic_0001>

<bundles_post_ra>
// kernel: tpu_custom_call.1
= control target key start
LH: loop header
LB: loop body
LE: loop exit
PB: predicated region body
PF: predicated region fallthrough
CT: control target
= control target key end

     0   :  { %s989_s0 = inlined_call_operand.hbm [shape: f32[32], index: 0, kind: input, shape index: {}]   ;;  %s990_s1 = inlined_call_operand.vmem [shape: f32[8], index: 1, kind: input, shape index: {}]   ;;  %s991_s2 = inlined_call_operand.hbm [shape: f32[2,8,128], index: 2, kind: input, shape index: {}]   ;;  %s992_s3 = inlined_call_operand.hbm [shape: f32[2,8,128], index: 3, kind: output, shape index: {}]  }
   0x1   :  { %999 = sst [smem:[#allocation16_spill]] %s989_s0 }
   0x2   :  { %1000 = sst [smem:[#allocation17_spill]] %s990_s1 }
   0x3   :  { %1001 = sst [smem:[#allocation18_spill]] %s991_s2 }
   0x4   :  { %8 = vsyncpa [#allocation5], 0 }
   0x5   :  { %9 = vsyncpa [#allocation6], 0 }
   0x6   :  { %10 = vsyncpa [#allocation3], 0 }
   0x7   :  { %12 = vsyncpa [#allocation3 + $0x1], 0 }
   0x8   :  { %13 = vsyncpa [#allocation4], 0 }
   0x9   :  { %15 = vsyncpa [#allocation4 + $0x1], 0  ;;  %s713_s12 = smov 0   ;;  %s715_s13 = smov 0  }
   0xa   :  { %s717_s14 = smov 0   ;;  %s719_s15 = smov 0  }
   0xb LB: > { %1002 = sst [smem:[#allocation14_spill]] %s683_s14  ;;  %s734_s16 = sadd.s32 4294967295, %s687_s15   ;;  %s687_s15 = sphi %s719_s15, %s1029_s15   ;;  %s683_s14 = sphi %s717_s14, %s1026_s14   ;;  %s679_s13 = sphi %s715_s13, %s1028_s13   ;;  %s675_s12 = sphi %s713_s12, %s1027_s12  }
   0xc   : > { %s464_s17 = sadd.s32 4294967294, %s687_s15   ;;  %p83_p0 = scmp.ne.s32.totalorder %s679_s13, %s675_s12 }
   0xd   : > { %p993_p1 = scmp.eq.s32.totalorder %s734_s16, 0  ;;  %p107_p2 = scmp.eq.s32.totalorder %s734_s16, 1 }
   0xe   : > { %p113_p3 = scmp.eq.s32.totalorder %s464_s17, 1  ;;  %p465_p5 = scmp.ge.s32.totalorder %s687_s15, 1 }
   0xf   : > { %p743_p4 = por %p993_p1, %p83_p0  ;;  %p120_p7 = scmp.lt.s32.totalorder %s687_s15, 3 }
  0x10   : > { %p748_p6 = por %p113_p3, %p83_p0  ;;  %s1006_s1 = sld [smem:[#allocation17_spill]] }
  0x11   : > { %s1003_s18 = scalar_select %p743_p4, 1, 0 }
  0x12   : > { %s1004_s19 = scalar_select %p748_p6, 1, 0 }
  0x13   : > { %p753_p8 = pnand %p465_p5, %p120_p7  ;;  %s764_s24 = sadd.s32 1, %s687_s15  }
  0x14   : > { %s67_s26 = ssub.s32 %s687_s15, %s764_s24  ;;  %s70_s27 = sadd.s32 1, %s683_s14 }
  0x15   : > { %s1005_s20 = scalar_select %p753_p8, 1, 0 }
  0x16   : > { %s142_s23 = sshll.u32 %s1006_s1, 4  ;;  %p506_p10 = pneg %p753_p8  ;;  %s143_s23 = int_to_ptr.vmem [resolvable:$true] %s142_s23 }
  0x17   : > { %p775_p12 = scmp.eq.s32.totalorder %s67_s26, 0  ;;  %s689_s29 = smov [#allocation2]  }
  0x18   : > { %p768_p11 = pnand %p506_p10, %p993_p1  ;;  %s1009_s0 = sld [smem:[#allocation16_spill]] }
  0x19   : > { %s572_s5 = scalar_lea.vmem %s143_s23, 16  ;;  %p580_p7 = scmp.lt.s32.totalorder %s143_s23, %s143_s23 }
  0x1a   : > { %p573_p13 = scmp.ne.s32.totalorder %s143_s23, %s572_s5  ;;  %p574_p0 = pneg %p768_p11 }
  0x1b   : > { %p581_p10 = scmp.lt.s32.totalorder %s572_s5, %s572_s5 }
  0x1c   : > { %p575_p3 = pnand %p574_p0, %p573_p13 }
  0x1d   : > { %p582_p9 = por %p581_p10, %p580_p7 }
  0x1e   : > { %509 = dma.hbm_to_smem (!%p768_p11), %s1009_s0, 16, %s689_s29, [#allocation5]  }
  0x1f   : > { %p576_p5 = pneg %p575_p3 }
  0x21   : > { %p583_p1 = pnand %p582_p9, %p576_p5 }
  0x23   : > { %586 = shalt.err (!%p583_p1)
}
  0x24   : > { %s690_s6 = smov [#allocation7]   ;;  %p77_p13 = scmp.ne.s32.totalorder %s683_s14, %s679_s13 }
  0x25   : > { %512 = dma.vmem_to_smem (!%p768_p11), %s143_s23, 16, %s690_s6, [#allocation6]  }
  0x26   : > { %s791_s7 = scalar_select %p775_p12, %s683_s14, %s70_s27  }
  0x27   : > { %p78_p0 = scmp.eq.s32.totalorder %s687_s15, 0  ;;  %p523_p9 = scmp.lt.s32.totalorder %s687_s15, 2 }
  0x28   : > { %1010 = sst [smem:[#allocation15_spill]] %s791_s7  ;;  %s153_s8 = sand.u32 1, %s683_s14  }
  0x29   : > { %p79_p1 = por %p78_p0, %p77_p13  ;;  %p800_p3 = por %p107_p2, %p77_p13 }
  0x2a   : > { %s469_s10 = sshll.u32 %s153_s8, 3  ;;  %s470_s11 = sshll.u32 %s687_s15, 7 }
  0x2b   : > { %s1011_s9 = scalar_select %p800_p3, 1, 0 }
  0x2c   : > { %s1012_s2 = sld [smem:[#allocation18_spill]]  ;;  %s157_s23 = scalar_lea.vmem [#allocation8], %s469_s10 }
  0x2d   : > { %s164_s25 = sshll.u32 %s157_s23, 4  ;;  %p810_p11 = pnand %p523_p9, %p79_p1  ;;  %s165_s25 = int_to_ptr.vmem [resolvable:$true] %s164_s25 }
  0x2e   : > { %s154_s27 = scalar_lea.sflag [#allocation3], %s153_s8 }
  0x2f   : > { %p589_p12 = pneg %p810_p11 }
  0x32   : > { %s808_s22 = scalar_lea.hbm %s1012_s2, %s470_s11  ;;  %s592_s4 = scalar_lea.hbm %s1012_s2, 256 }
  0x33   : > { %s587_s28 = scalar_lea.hbm %s808_s22, 128  ;;  %p593_p10 = scmp.lt.s32.totalorder %s808_s22, %s1012_s2 }
  0x34   : > { %p588_p2 = scmp.ne.s32.totalorder %s808_s22, %s587_s28  ;;  %p594_p13 = scmp.lt.s32.totalorder %s592_s4, %s587_s28 }
  0x36   : > { %p590_p5 = pnand %p589_p12, %p588_p2  ;;  %p595_p0 = por %p594_p13, %p593_p10 }
  0x38   : > { %p591_p7 = pneg %p590_p5 }
  0x3a   : > { %p596_p9 = pnand %p595_p0, %p591_p7 }
  0x3c   : > { %599 = shalt.err (!%p596_p9)
}
  0x3d   : > { %s600_s10 = scalar_lea.vmem %s165_s25, 128  ;;  %s691_s8 = smov [#allocation8]  }
  0x3e   : > { %p601_p1 = scmp.ne.s32.totalorder %s165_s25, %s600_s10  ;;  %s605_s11 = sshll.u32 %s691_s8, 4  ;;  %s606_s11 = int_to_ptr.vmem [resolvable:$false] %s605_s11 }
  0x3f   : > { %s607_s17 = scalar_lea.vmem %s606_s11, 256  ;;  %p608_p2 = scmp.lt.s32.totalorder %s165_s25, %s606_s11 }
  0x40   : > { %p603_p6 = pnand %p601_p1, %p589_p12  ;;  %p609_p5 = scmp.lt.s32.totalorder %s607_s17, %s600_s10 }
  0x42   : > { %p604_p3 = pneg %p603_p6  ;;  %p610_p4 = por %p609_p5, %p608_p2 }
  0x44   : > { %p611_p8 = pnand %p610_p4, %p604_p3 }
  0x46   : > { %614 = shalt.err (!%p611_p8)
}
  0x47   : > { %516 = dma.hbm_to_vmem [thread:$0]  (!%p810_p11), %s808_s22, 128, %s165_s25, %s154_s27  }
  0x48   : > { %p1014_p7 = scmp.ne.s32.totalorder %s1005_s20, 0 }
  0x49   : > { %p1015_p10 = scmp.eq.s32.totalorder (!%p1014_p7), %s734_s16, 0 }
  0x4a   : > { %173 = sbr.rel (%p1014_p7) target bundleno = 137 (0x89), region = 32 }
  0x4f   : > { %658 = dma.done.wait (%p1015_p10), [#allocation5], 16   ;;  %p1016_p6 = pmov %p1015_p10 }
  0x51   : > { %660 = vsyncadd (%p1016_p6), [#allocation5], 4294967280  ;;  %p1017_p12 = pmov %p1016_p6 }
  0x52   : > { %p1018_p13 = pmov %p1016_p6 }
  0x53   : > { %662 = dma.done.wait (%p1017_p12), [#allocation6], 16  }
  0x54   : > { %664 = vsyncadd (%p1018_p13), [#allocation6], 4294967280  ;;  %s839_s21 = sand.u32 1, %s679_s13   ;;  %p1019_p4 = scmp.ne.s32.totalorder %s1003_s18, 0 }
  0x55   : > { %s997_s20 = sshll.u32 %s839_s21, 3  ;;  %s184_s22 = scalar_lea.sflag [#allocation3], %s839_s21 }
  0x56   : > { %s187_s23 = scalar_lea.vmem [#allocation8], %s997_s20 }
  0x57   : > { %666 = dma.done.wait (%p1019_p4), %s184_s22, 128  }
  0x58   : > { %668 = vsyncadd (%p1019_p4), %s184_s22, 4294967168 }
  0x59   : > { %192 = sfence }
  0x5a   : > { %s850_s25 = sshll.u32 %s734_s16, 4  ;;  %s853_s26 = sshll.u32 %s734_s16, 2  ;;  %v885_v1 = vld [vmem:[%s187_s23] sm:$0xff]  ;;  %vm349_vm0 = vcmask 1041408   ;;  %vm351_vm1 = vcmask 1043456   ;;  %vm353_vm2 = vcmask 1045504  }
  0x5b   : > { %s213_s27 = sld [smem:[#allocation2 + %s850_s25]]  ;;  %s858_s29 = sadd.s32 4, %s850_s25 }
  0x5c   : > { %s861_s18 = sld [smem:[#allocation2 + %s858_s29]]  ;;  %s864_s30 = sadd.s32 8, %s850_s25 }
  0x5d   : > { %s867_s4 = sld [smem:[#allocation2 + %s864_s30]]  ;;  %s870_s5 = sadd.s32 12, %s850_s25 }
  0x5e   : > { %s873_s6 = sld [smem:[#allocation2 + %s870_s5]]  ;;  %s232_s10 = sadd.s32 1, %s850_s25 }
  0x5f   : > { %s233_s8 = sld [smem:[#allocation2 + %s232_s10]]  ;;  %s240_s11 = sadd.s32 1, %s858_s29 }
  0x60   : > { %s241_s17 = sld [smem:[#allocation2 + %s240_s11]]  ;;  %s248_s22 = sadd.s32 1, %s864_s30 }
  0x61   : > { %s249_s20 = sld [smem:[#allocation2 + %s248_s22]]  ;;  %s256_s28 = sadd.s32 1, %s870_s5  ;;  %v214_v0 = vstv %s213_s27 }
  0x62   : > { %s879_s0 = sld [smem:[#allocation2 + %s256_s28]]  ;;  %s264_s1 = sadd.s32 2, %s850_s25  ;;  %v220_v2 = vstv %s861_s18  ;;  %v215_v5 = vmul.f32 %v214_v0, %v885_v1 }
  0x63   : > { %s882_s2 = sld [smem:[#allocation2 + %s264_s1]]  ;;  %s272_s7 = sadd.s32 2, %s858_s29  ;;  %v225_v3 = vstv %s867_s4  ;;  %v221_v9 = vmul.f32 %v220_v2, %v885_v1 }
  0x64   : > { %s888_s14 = sld [smem:[#allocation2 + %s272_s7]]  ;;  %s280_s10 = sadd.s32 2, %s864_s30  ;;  %v230_v6 = vstv %s873_s6  ;;  %v226_v12 = vmul.f32 %v225_v3, %v885_v1 }
  0x65   : > { %v234_v4 = vstv %s233_s8  ;;  %s892_s11 = sld [smem:[#allocation2 + %s280_s10]]  ;;  %s288_s28 = sadd.s32 2, %s870_s5  ;;  %v231_v16 = vmul.f32 %v230_v6, %v885_v1 }
  0x66   : > { %v235_v7 = vmul.f32 %v234_v4, %v885_v1  ;;  %v242_v8 = vstv %s241_s17  ;;  %s898_s1 = sld [smem:[#allocation2 + %s288_s28]]  ;;  %s296_s7 = sadd.s32 3, %s850_s25 }
  0x67   : > { %v243_v10 = vmul.f32 %v242_v8, %v885_v1  ;;  %v250_v11 = vstv %s249_s20  ;;  %s903_s23 = sld [smem:[#allocation2 + %s296_s7]]  ;;  %s304_s27 = sadd.s32 3, %s858_s29 }
  0x68   : > { %v237_v13 = vrot.slane %v235_v7, 2  ;;  %v251_v14 = vmul.f32 %v250_v11, %v885_v1  ;;  %v258_v15 = vstv %s879_s0  ;;  %s909_s18 = sld [smem:[#allocation2 + %s304_s27]]  ;;  %s312_s25 = sadd.s32 3, %s864_s30 }
  0x69   : > { %v245_v17 = vrot.slane %v243_v10, 2  ;;  %v259_v18 = vmul.f32 %v258_v15, %v885_v1  ;;  %v266_v19 = vstv %s882_s2  ;;  %s915_s20 = sld [smem:[#allocation2 + %s312_s25]]  ;;  %s320_s29 = sadd.s32 3, %s870_s5 }
  0x6a   : > { %s222_s4 = sadd.s32 2, %s853_s26  ;;  %v239_v20 = vadd.f32 %v237_v13, %v215_v5  ;;  %v253_v21 = vrot.slane %v251_v14, 2  ;;  %v267_v22 = vmul.f32 %v266_v19, %v885_v1  ;;  %v274_v23 = vstv %s888_s14  ;;  %s921_s0 = sld [smem:[#allocation2 + %s320_s29]] }
  0x6b   : > { %s227_s30 = sadd.s32 3, %s853_s26  ;;  %v247_v24 = vadd.f32 %v245_v17, %v221_v9  ;;  %v261_v25 = vrot.slane %v259_v18, 2  ;;  %v275_v26 = vmul.f32 %v274_v23, %v885_v1  ;;  %v282_v27 = vstv %s892_s11  ;;  %s927_s2 = sld [smem:[#allocation7 + %s853_s26]] }
  0x6c   : > { %v255_v28 = vadd.f32 %v253_v21, %v226_v12  ;;  %v269_v29 = vrot.slane %v267_v22, 4  ;;  %v283_v30 = vmul.f32 %v282_v27, %v885_v1  ;;  %v290_v31 = vstv %s898_s1  ;;  %s1020_s5 = sadd.s32 1, %s853_s26  ;;  %s334_s6 = sld [smem:[#allocation7 + %s222_s4]] }
  0x6d   : > { %s933_s14 = sld [smem:[#allocation7 + %s1020_s5]]  ;;  %v263_v32 = vadd.f32 %v261_v25, %v231_v16  ;;  %v277_v33 = vrot.slane %v275_v26, 4  ;;  %v291_v34 = vmul.f32 %v290_v31, %v885_v1  ;;  %v298_v35 = vstv %s903_s23  ;;  %s1021_s26 = sshll.u32 %s839_s21, 3 }
  0x6e   : > { %v271_v36 = vadd.f32 %v269_v29, %v239_v20  ;;  %v285_v37 = vrot.slane %v283_v30, 4  ;;  %v299_v38 = vmul.f32 %v298_v35, %v885_v1  ;;  %v306_v39 = vstv %s909_s18  ;;  %s337_s8 = sld [smem:[#allocation7 + %s227_s30]]  ;;  %s210_s17 = scalar_lea.vmem [#allocation9], %s1021_s26 }
  0x6f   : > { %v279_v40 = vadd.f32 %v277_v33, %v247_v24  ;;  %v293_v41 = vrot.slane %v291_v34, 4  ;;  %v307_v42 = vmul.f32 %v306_v39, %v885_v1  ;;  %v314_v43 = vstv %s915_s20  ;;  %s370_s22 = sshll.u32 %s210_s17, 4  ;;  %s482_s10 = sshll.u32 %s734_s16, 7  ;;  %s949_s22 = int_to_ptr.vmem [resolvable:$true] %s370_s22 }
  0x70   : > { %v287_v44 = vadd.f32 %v285_v37, %v255_v28  ;;  %v301_v45 = vrot.slane %v299_v38, 6  ;;  %v315_v46 = vmul.f32 %v314_v43, %v885_v1  ;;  %v322_v47 = vstv %s921_s0  ;;  %s368_s1 = scalar_lea.hbm %s992_s3, %s482_s10  ;;  %s357_s7 = scalar_lea.sflag [#allocation4], %s839_s21 }
  0x71   : > { %v295_v48 = vadd.f32 %v293_v41, %v263_v32  ;;  %v309_v49 = vrot.slane %v307_v42, 6  ;;  %v323_v50 = vmul.f32 %v322_v47, %v885_v1  ;;  %v329_v53 = vstv %s927_s2  ;;  %s615_s23 = scalar_lea.vmem %s949_s22, 128  ;;  %p1022_p3 = scmp.ne.s32.totalorder %s1011_s9, 0 }
  0x72   : > { %v303_v51 = vadd.f32 %v301_v45, %v271_v36  ;;  %v317_v52 = vrot.slane %v315_v46, 6  ;;  %v335_v57 = vstv %s334_s6  ;;  %p616_p8 = scmp.ne.s32.totalorder %s949_s22, %s615_s23  ;;  %s692_s16 = smov [#allocation9]  }
  0x73   : > { %v332_v54 = vstv %s933_s14  ;;  %v311_v55 = vadd.f32 %v309_v49, %v279_v40  ;;  %v325_v56 = vrot.slane %v323_v50, 6  ;;  %s619_s27 = sshll.u32 %s692_s16, 4  ;;  %s620_s27 = int_to_ptr.vmem [resolvable:$false] %s619_s27 }
  0x74   : > { %v319_v58 = vadd.f32 %v317_v52, %v287_v44  ;;  %v338_v59 = vstv %s337_s8  ;;  %v330_v61 = vadd.f32 %v329_v53, %v303_v51  ;;  %p617_p11 = pnand %p616_p8, %p1022_p3  ;;  %s621_s18 = scalar_lea.vmem %s620_s27, 256 }
  0x75   : > { %v327_v60 = vadd.f32 %v325_v56, %v295_v48  ;;  %v333_v62 = vadd.f32 %v332_v54, %v311_v55  ;;  %p622_p9 = scmp.lt.s32.totalorder %s949_s22, %s620_s27  ;;  %p623_p1 = scmp.lt.s32.totalorder %s621_s18, %s615_s23 }
  0x76   : > { %v336_v63 = vadd.f32 %v335_v57, %v319_v58  ;;  %p618_p0 = pneg %p617_p11 }
  0x77   : > { %v339_v0 = vadd.f32 %v338_v59, %v327_v60  ;;  %v341_v1 = vrot.slane %v333_v62, 6  ;;  %p624_p2 = por %p623_p1, %p622_p9 }
  0x78   : > { %v344_v2 = vrot.slane %v336_v63, 4 }
  0x79   : > { %v347_v3 = vrot.slane %v339_v0, 2  ;;  %v350_v4 = vsel %vm349_vm0, %v330_v61, %v341_v1  ;;  %p625_p5 = pnand %p624_p2, %p618_p0 }
  0x7a   : > { %v352_v5 = vsel %vm351_vm1, %v350_v4, %v344_v2 }
  0x7b   : > { %v354_v6 = vsel %vm353_vm2, %v352_v5, %v347_v3 }
  0x7c   : > { %355 = vst [vmem:[%s210_s17] sm:$0xff] %v354_v6 }
  0x7d   : > { %628 = shalt.err (!%p625_p5)
}
  0x7e   : > { %s629_s25 = scalar_lea.hbm %s368_s1, 128  ;;  %s633_s29 = scalar_lea.hbm %s992_s3, 256 }
  0x7f   : > { %p630_p7 = scmp.ne.s32.totalorder %s368_s1, %s629_s25  ;;  %p634_p12 = scmp.lt.s32.totalorder %s368_s1, %s992_s3 }
  0x80   : > { %p635_p13 = scmp.lt.s32.totalorder %s633_s29, %s629_s25 }
  0x81   : > { %p631_p10 = pnand %p630_p7, %p1022_p3 }
  0x82   : > { %p636_p4 = por %p635_p13, %p634_p12 }
  0x83   : > { %p632_p6 = pneg %p631_p10 }
  0x85   : > { %p637_p8 = pnand %p636_p4, %p632_p6 }
  0x87   : > { %640 = shalt.err (!%p637_p8)
}
  0x88   : > { %504 = dma.vmem_to_hbm [thread:$0]  (%p1022_p3), %s949_s22, 128, %s368_s1, %s357_s7  }
  0x89 PF: > { %s382_s30 = sand.u32 1, %s675_s12   ;;  %p1023_p11 = scmp.ne.s32.totalorder %s1004_s19, 0 }
  0x8a   : > { %p1024_p0 = scmp.ge.s32.totalorder %s687_s15, 2  ;;  %s383_s2 = scalar_lea.sflag [#allocation4], %s382_s30 }
  0x8c   : > { %p518_p9 = pnand %p1024_p0, %p1023_p11 }
  0x8e   : > { %p519_p1 = pneg %p518_p9 }
  0x90   : > { %670 = dma.done.wait (%p519_p1), %s383_s2, 128  }
  0x91   : > { %672 = vsyncadd (%p519_p1), %s383_s2, 4294967168  ;;  %s1025_s5 = sld [smem:[#allocation14_spill]]  ;;  %p18_p2 = scmp.ge.s32.totalorder %s764_s24, 4  }
  0x92   : > { %s1026_s14 = sld [smem:[#allocation15_spill]]  ;;  %s1027_s12 = smov %s679_s13 }
  0x93   : > { %s1029_s15 = smov %s764_s24  ;;  %20 = sbr.rel (!%p18_p2) target bundleno = 11 (0xb), region = 87 }
  0x97   : > { %s1028_s13 = smov %s1025_s5 }
  0x98   :  { %388 = vsyncpa [#allocation3], 1 }
  0x99   :  { %390 = vsyncpa [#allocation3 + $0x1], 1 }
  0x9a   :  { %391 = vsyncpa [#allocation4], 1 }
  0x9b   :  { %393 = vsyncpa [#allocation4 + $0x1], 1 }
  0x9c   :  { %394 = vsyncpa [#allocation5], 1 }
  0x9d   :  { %396 = vsyncpa [#allocation5 + $0x1], 1 }
  0x9e   :  { %397 = vsyncpa [#allocation6], 1 }
  0x9f   :  { %399 = vsyncpa [#allocation6 + $0x1], 1 }

</bundles_post_ra>
